<compile_context>
chip_gen: v7x
topology: tpu7x:2x2x1
jax: 0.10.0
libtpu: 0.0.40
codegen_flags: <defaults>
</compile_context>

<pallas_src>
import functools

import jax
import jax.numpy as jnp
from jax import lax
from jax.experimental import pallas as pl
from jax.experimental.pallas import tpu as pltpu


def _distill_kl_kernel(ys_ref, yt_ref, out_ref, *, temperature, batch,
                       tile_b, need_mask):
    """Per-batch-tile partial sum of KL(p_t || p_s); writes one (1,8,128) block."""
    inv_t = jnp.float32(1.0 / temperature)
    ys = ys_ref[...].astype(jnp.float32) * inv_t
    yt = yt_ref[...].astype(jnp.float32) * inv_t

    # Student: shifted log-sum-exp (softmax axis = classes = lane axis).
    ys_shift = ys - jnp.max(ys, axis=-1, keepdims=True)
    log_zs = jnp.log(jnp.sum(jnp.exp(ys_shift), axis=-1, keepdims=True))

    # Teacher: shifted exp + normalizer.
    yt_shift = yt - jnp.max(yt, axis=-1, keepdims=True)
    yt_exp = jnp.exp(yt_shift)
    zt = jnp.sum(yt_exp, axis=-1, keepdims=True)

    # Fused per-row KL:
    #   sum_c p_t*(log p_t - log p_s)
    #     = sum_c yt_exp*(yt_shift - ys_shift)/zt + (log_zs - log zt)
    row_dot = jnp.sum(yt_exp * (yt_shift - ys_shift), axis=-1, keepdims=True)
    # Exact per-row scalar divide (tiny (tile_b,1) column; accuracy > EUP slot).
    row_kl = row_dot / zt + (log_zs - jnp.log(zt))          # (tile_b, 1)

    if need_mask:
        # Last tile may extend past the true batch; zero out invalid rows.
        row0 = pl.program_id(0) * tile_b
        ridx = lax.broadcasted_iota(jnp.int32, row_kl.shape, 0) + row0
        row_kl = jnp.where(ridx < batch, row_kl, jnp.float32(0.0))

    part = jnp.sum(row_kl, axis=0, keepdims=True)           # (1, 1)
    # Lane-dense, (8,128)-compliant store; wrapper reads [:, 0, 0].
    out_ref[...] = jnp.broadcast_to(part[None], out_ref.shape)


def _vmem_capacity_bytes():
    """Physical VMEM capacity; fallback keyed off device_kind (not hardcoded v7x)."""
    try:
        return int(pltpu.get_tpu_info().vmem_capacity_bytes)
    except Exception:
        pass
    try:
        kind = jax.devices()[0].device_kind.lower()
    except Exception:
        kind = ""
    if "v7" in kind:
        return 64 << 20     # v7x: 64 MiB per TensorCore
    return 128 << 20        # v5e / v6e: 128 MiB


def _pick_tile_b(B, per_row_bytes, budget_bytes):
    """Largest batch tile whose buffers + temporaries fit the VMEM budget."""
    b_pad8 = ((B + 7) // 8) * 8
    tile_b = budget_bytes // max(per_row_bytes, 1)
    if tile_b >= 16:
        # Multiple of 16: bf16 sublane packing (and trivially a multiple of 8).
        tile_b = (tile_b // 16) * 16
    else:
        # Even 16 rows exceed the budget (very large C): floor at 8 and bump
        # the scoped-VMEM limit in the caller.
        # TODO(synk): class-axis tiling path for this regime.
        tile_b = 8
    tile_b = min(tile_b, 4096)          # raised cap (was 1024)
    tile_b = min(tile_b, b_pad8)
    # Prefer >= 2 grid steps so the "parallel" grid axis actually shards
    # across both TensorCores on v7x (harmless on single-TC v5e/v6e).
    if b_pad8 >= 16 and tile_b >= b_pad8:
        half = ((b_pad8 // 2 + 7) // 8) * 8
        tile_b = max(8, min(tile_b, half))
    return tile_b


def distill_kl(y_s, y_t, temperature, *, tile_b=None):
    """DistillKL forward. y_s, y_t: [B, C] logits (any float dtype) -> f32 scalar."""
    assert y_s.shape == y_t.shape and y_s.ndim == 2
    B, C = y_s.shape
    its, itt = y_s.dtype.itemsize, y_t.dtype.itemsize

    cap = _vmem_capacity_bytes()
    usable = max(32 << 20, min(cap - (16 << 20), 112 << 20))

    # Per-row VMEM: double-buffered native-dtype inputs + ~7 live f32 C-wide
    # temporaries inside the kernel body.
    per_row = C * (2 * (its + itt) + 7 * 4)

    if tile_b is None:
        tile_b = _pick_tile_b(B, per_row, int(usable * 0.7))
    assert tile_b >= 8 and tile_b % 8 == 0

    num_tiles = -(-B // tile_b)                 # cdiv
    need_mask = (num_tiles * tile_b != B)

    kernel = functools.partial(
        _distill_kl_kernel,
        temperature=float(temperature),
        batch=B,
        tile_b=tile_b,
        need_mask=need_mask,
    )

    # Scoped-VMEM limit: normally the generous budget; if a minimal 8-row tile
    # at huge C needs more, grow toward the physical cap (minus headroom).
    est_bytes = tile_b * per_row + 2 * (8 * 128 * 4)
    vmem_limit = int(min(max(cap - (8 << 20), 32 << 20),
                         max(usable, int(est_bytes * 1.25))))

    cost = pl.CostEstimate(
        flops=int(10 * B * C),
        transcendentals=int(2 * B * C + 2 * B),
        bytes_accessed=int(B * C * (its + itt) + num_tiles * 8 * 128 * 4),
    )

    partials = pl.pallas_call(
        kernel,
        out_shape=jax.ShapeDtypeStruct((num_tiles, 8, 128), jnp.float32),
        grid_spec=pltpu.PrefetchScalarGridSpec(
            num_scalar_prefetch=0,
            grid=(num_tiles,),
            in_specs=[
                # Native-dtype DMA (bf16 stays bf16); cast to f32 in-kernel.
                pl.BlockSpec((tile_b, C), lambda i: (i, 0)),
                pl.BlockSpec((tile_b, C), lambda i: (i, 0)),
            ],
            out_specs=pl.BlockSpec((1, 8, 128), lambda i: (i, 0, 0)),
        ),
        compiler_params=pltpu.CompilerParams(
            # Independent per-tile partial sums -> megacore-shardable on v7x.
            dimension_semantics=("parallel",),
            vmem_limit_bytes=vmem_limit,
        ),
        cost_estimate=cost,
    )(y_s, y_t)

    # Tiny final reduce + PyTorch scaling (uses the *original* batch size).
    scale = jnp.float32(float(temperature) * float(temperature) / B)
    return jnp.sum(partials[:, 0, 0]) * scale


def _distill_kl_ref(y_s, y_t, temperature):
    """Pure-JAX reference matching the PyTorch module."""
    t = jnp.float32(temperature)
    log_p_s = jax.nn.log_softmax(y_s.astype(jnp.float32) / t, axis=1)
    p_t = jax.nn.softmax(y_t.astype(jnp.float32) / t, axis=1)
    kl = jnp.sum(p_t * (jnp.log(p_t) - log_p_s))
    return kl * t * t / y_s.shape[0]


if __name__ == "__main__":
    key = jax.random.PRNGKey(0)
    k1, k2, k3, k4 = jax.random.split(key, 4)

    T = 4.0  # distillation temperature (module __init__ arg)

    # Primary small test: divisible batch, auto tile selection.
    B, C = 8, 32
    y_s = jax.random.normal(k1, (B, C), dtype=jnp.float32)
    y_t = jax.random.normal(k2, (B, C), dtype=jnp.float32)
    loss = jax.block_until_ready(distill_kl(y_s, y_t, T))
    ref = _distill_kl_ref(y_s, y_t, T)
    assert jnp.allclose(loss, ref, rtol=1e-5, atol=1e-5), (loss, ref)

    # Ragged-batch test: exercises the in-kernel last-tile row masking
    # (no wrapper-side padding copies).
    B2, C2 = 12, 32
    y_s2 = jax.random.normal(k3, (B2, C2), dtype=jnp.float32)
    y_t2 = jax.random.normal(k4, (B2, C2), dtype=jnp.float32)
    loss2 = jax.block_until_ready(distill_kl(y_s2, y_t2, T, tile_b=8))
    ref2 = _distill_kl_ref(y_s2, y_t2, T)
    assert jnp.allclose(loss2, ref2, rtol=1e-5, atol=1e-5), (loss2, ref2)

    print("KERNEL_OK")
</pallas_src>

<mosaic_0001>
module attributes {stable_mosaic.version = 11 : i64} {
  func.func @_distill_kl_kernel(%arg0: i32, %arg1: memref<8x32xf32, #tpu.memory_space<vmem>>, %arg2: memref<8x32xf32, #tpu.memory_space<vmem>>, %arg3: memref<1x8x128xf32, #tpu.memory_space<vmem>>) attributes {dimension_semantics = [#tpu.dimension_semantics<parallel>], iteration_bounds = array<i64: 1>, scalar_prefetch = 0 : i64, scratch_operands = 0 : i64, tpu.core_type = #tpu.core_type<tc>, window_params = [{transform_indices = @transform_0, window_bounds = array<i64: 8, 32>}, {transform_indices = @transform_1, window_bounds = array<i64: 8, 32>}, {transform_indices = @transform_2, window_bounds = array<i64: 1, 8, 128>}]} {
    %c0 = arith.constant 0 : index
    %c0_0 = arith.constant 0 : index
    %0 = vector.load %arg1[%c0, %c0_0] : memref<8x32xf32, #tpu.memory_space<vmem>>, vector<8x32xf32>
    %cst = arith.constant 2.500000e-01 : f32
    %1 = vector.broadcast %cst : f32 to vector<8x32xf32>
    %2 = arith.mulf %0, %1 : vector<8x32xf32>
    %c0_1 = arith.constant 0 : index
    %c0_2 = arith.constant 0 : index
    %3 = vector.load %arg2[%c0_1, %c0_2] : memref<8x32xf32, #tpu.memory_space<vmem>>, vector<8x32xf32>
    %cst_3 = arith.constant 2.500000e-01 : f32
    %4 = vector.broadcast %cst_3 : f32 to vector<8x32xf32>
    %5 = arith.mulf %3, %4 : vector<8x32xf32>
    %cst_4 = arith.constant dense<0xFF800000> : vector<8xf32>
    %6 = vector.multi_reduction <maximumf>, %2, %cst_4 [1] : vector<8x32xf32> to vector<8xf32>
    %7 = vector.shape_cast %6 : vector<8xf32> to vector<8x1xf32>
    %8 = vector.broadcast %7 : vector<8x1xf32> to vector<8x32xf32>
    %9 = arith.subf %2, %8 : vector<8x32xf32>
    %10 = math.exp %9 : vector<8x32xf32>
    %cst_5 = arith.constant dense<0.000000e+00> : vector<8xf32>
    %11 = vector.multi_reduction <add>, %10, %cst_5 [1] : vector<8x32xf32> to vector<8xf32>
    %12 = vector.shape_cast %11 : vector<8xf32> to vector<8x1xf32>
    %13 = math.log %12 : vector<8x1xf32>
    %cst_6 = arith.constant dense<0xFF800000> : vector<8xf32>
    %14 = vector.multi_reduction <maximumf>, %5, %cst_6 [1] : vector<8x32xf32> to vector<8xf32>
    %15 = vector.shape_cast %14 : vector<8xf32> to vector<8x1xf32>
    %16 = vector.broadcast %15 : vector<8x1xf32> to vector<8x32xf32>
    %17 = arith.subf %5, %16 : vector<8x32xf32>
    %18 = math.exp %17 : vector<8x32xf32>
    %cst_7 = arith.constant dense<0.000000e+00> : vector<8xf32>
    %19 = vector.multi_reduction <add>, %18, %cst_7 [1] : vector<8x32xf32> to vector<8xf32>
    %20 = vector.shape_cast %19 : vector<8xf32> to vector<8x1xf32>
    %21 = arith.subf %17, %9 : vector<8x32xf32>
    %22 = arith.mulf %18, %21 : vector<8x32xf32>
    %cst_8 = arith.constant dense<0.000000e+00> : vector<8xf32>
    %23 = vector.multi_reduction <add>, %22, %cst_8 [1] : vector<8x32xf32> to vector<8xf32>
    %24 = vector.shape_cast %23 : vector<8xf32> to vector<8x1xf32>
    %25 = arith.divf %24, %20 : vector<8x1xf32>
    %26 = math.log %20 : vector<8x1xf32>
    %27 = arith.subf %13, %26 : vector<8x1xf32>
    %28 = arith.addf %25, %27 : vector<8x1xf32>
    %cst_9 = arith.constant dense<0.000000e+00> : vector<1xf32>
    %29 = vector.multi_reduction <add>, %28, %cst_9 [0] : vector<8x1xf32> to vector<1xf32>
    %30 = vector.shape_cast %29 : vector<1xf32> to vector<1x1xf32>
    %31 = vector.shape_cast %30 : vector<1x1xf32> to vector<1x1x1xf32>
    %32 = vector.shape_cast %31 : vector<1x1x1xf32> to vector<1x1x1xf32>
    %33 = vector.broadcast %32 : vector<1x1x1xf32> to vector<1x8x128xf32>
    %c0_10 = arith.constant 0 : index
    %c0_11 = arith.constant 0 : index
    %c0_12 = arith.constant 0 : index
    %34 = vector.load %arg3[%c0_10, %c0_11, %c0_12] : memref<1x8x128xf32, #tpu.memory_space<vmem>>, vector<1x8x128xf32>
    tpu.vector_store %arg3[%c0_10, %c0_11, %c0_12], %33 {strides = array<i32>} : memref<1x8x128xf32, #tpu.memory_space<vmem>>, vector<1x8x128xf32>,
    return
  }
  func.func @transform_0(%arg0: i32) -> (i32, i32) {
    %c0_i32 = arith.constant 0 : i32
    %c0_i32_0 = arith.constant 0 : i32
    return %arg0, %c0_i32 : i32, i32
  }
  func.func @transform_1(%arg0: i32) -> (i32, i32) {
    %c0_i32 = arith.constant 0 : i32
    %c0_i32_0 = arith.constant 0 : i32
    return %arg0, %c0_i32 : i32, i32
  }
  func.func @transform_2(%arg0: i32) -> (i32, i32, i32) {
    %c0_i32 = arith.constant 0 : i32
    %c0_i32_0 = arith.constant 0 : i32
    %c0_i32_1 = arith.constant 0 : i32
    return %arg0, %c0_i32, %c0_i32_0 : i32, i32, i32
  }
}

</mosaic_0001>

<bundles_post_ra>
// kernel: tpu_custom_call.1
= control target key start
LH: loop header
LB: loop body
LE: loop exit
PB: predicated region body
PF: predicated region fallthrough
CT: control target
= control target key end

     0   :  { %7 = vsyncpa [#allocation3], 0  ;;  %s239_s0 = inlined_call_operand.hbm [shape: f32[8,32], index: 0, kind: input, shape index: {}]   ;;  %s240_s1 = inlined_call_operand.hbm [shape: f32[8,32], index: 1, kind: input, shape index: {}]   ;;  %s241_s2 = inlined_call_operand.hbm [shape: f32[1,8,128], index: 2, kind: output, shape index: {}]  }
   0x1   :  { %8 = vsyncpa [#allocation6], 0 }
   0x2   :  { %9 = vsyncpa [#allocation4], 0  ;;  %s180_s9 = smov [#allocation2]   ;;  %s181_s11 = smov [#allocation5]  }
   0x3   :  { %s16_s10 = sshll.u32 %s180_s9, 4  ;;  %s26_s12 = sshll.u32 %s181_s11, 4  ;;  %s17_s10 = int_to_ptr.vmem [resolvable:$true] %s16_s10  ;;  %s27_s12 = int_to_ptr.vmem [resolvable:$true] %s26_s12 }
   0x4   :  { %s108_s15 = scalar_lea.hbm %s239_s0, 128 }
   0x5   :  { %p109_p0 = scmp.ne.s32.totalorder %s239_s0, %s108_s15  ;;  %p112_p1 = scmp.lt.u32.totalorder %s108_s15, %s239_s0 }
   0x7   :  { %p114_p2 = pnand %p112_p1, %p109_p0 }
   0x9   :  { %117 = shalt.err (!%p114_p2)
}
   0xa   :  { %s118_s20 = scalar_lea.vmem %s17_s10, 128  ;;  %p123_p4 = scmp.lt.s32.totalorder %s17_s10, %s17_s10 }
   0xb   :  { %p119_p3 = scmp.ne.s32.totalorder %s17_s10, %s118_s20  ;;  %p124_p5 = scmp.lt.s32.totalorder %s118_s20, %s118_s20 }
   0xd   :  { %p125_p6 = por %p124_p5, %p123_p4 }
   0xf   :  { %p126_p7 = pnand %p125_p6, %p119_p3 }
  0x11   :  { %129 = shalt.err (!%p126_p7)
}
  0x12   :  { %19 = dma.hbm_to_vmem [thread:$0]  %s239_s0, 128, %s17_s10, [#allocation3]  }
  0x13   :  { %s130_s25 = scalar_lea.hbm %s240_s1, 128 }
  0x14   :  { %p131_p8 = scmp.ne.s32.totalorder %s240_s1, %s130_s25  ;;  %p134_p9 = scmp.lt.u32.totalorder %s130_s25, %s240_s1 }
  0x16   :  { %p136_p10 = pnand %p134_p9, %p131_p8 }
  0x18   :  { %139 = shalt.err (!%p136_p10)
}
  0x19   :  { %s140_s30 = scalar_lea.vmem %s27_s12, 128  ;;  %p145_p12 = scmp.lt.s32.totalorder %s27_s12, %s27_s12 }
  0x1a   :  { %p141_p11 = scmp.ne.s32.totalorder %s27_s12, %s140_s30  ;;  %p146_p13 = scmp.lt.s32.totalorder %s140_s30, %s140_s30 }
  0x1c   :  { %p147_p0 = por %p146_p13, %p145_p12 }
  0x1e   :  { %p148_p1 = pnand %p147_p0, %p141_p11 }
  0x20   :  { %151 = shalt.err (!%p148_p1)
}
  0x21   :  { %29 = dma.hbm_to_vmem [thread:$0]  %s240_s1, 128, %s27_s12, [#allocation6]  }
  0x22   :  { %174 = dma.done.wait [#allocation3], 128  }
  0x23   :  { %175 = vsyncadd [#allocation3], 4294967168 }
  0x24   :  { %176 = dma.done.wait [#allocation6], 128  }
  0x25   :  { %177 = vsyncadd [#allocation6], 4294967168  ;;  %v36_v0 = vld [vmem:[#allocation2] sm:$0xff]  ;;  %vm40_vm0 = vcmask 261120   ;;  %v38_v1 = vld [vmem:[#allocation5] sm:$0xff]  ;;  %s182_s1 = smov [#allocation7]  }
  0x26   :  { %v37_v2 = vmul.f32 0.25, %v36_v0  ;;  %v39_v3 = vmul.f32 0.25, %v38_v1  ;;  %s85_s4 = sshll.u32 %s182_s1, 4  ;;  %s86_s4 = int_to_ptr.vmem [resolvable:$true] %s85_s4 }
  0x27   :  { %s152_s5 = scalar_lea.vmem %s86_s4, 128  ;;  %p157_p3 = scmp.lt.s32.totalorder %s86_s4, %s86_s4 }
  0x28   :  { %v41_v4 = vsel %vm40_vm0, %v37_v2, -inf  ;;  %v52_v5 = vsel %vm40_vm0, %v39_v3, -inf  ;;  %p153_p2 = scmp.ne.s32.totalorder %s86_s4, %s152_s5  ;;  %p158_p4 = scmp.lt.s32.totalorder %s152_s5, %s152_s5 }
  0x29   :  { %42 = vmax.xlane.f32.xlu0 %v41_v4 }
  0x2a   :  { %p159_p5 = por %p158_p4, %p157_p3 }
  0x2c   :  { %p160_p6 = pnand %p159_p5, %p153_p2 }
  0x2d   :  { %53 = vmax.xlane.f32.xlu0 %v52_v5 }
  0xb6   :  { %v43_v6 = vpop.xlane.xlu0 %42 }
  0xb7   :  { %v44_v7 = vsub.f32 %v37_v2, %v43_v6 }
  0xb9   :  { %v45_v8 = vmul.f32 1.442695, %v44_v7 }
  0xba   :  { %v54_v9 = vpop.xlane.xlu0 %53 }
  0xbb   :  { %98 = vpow2.f32 %v45_v8  ;;  %v55_v10 = vsub.f32 %v39_v3, %v54_v9 }
  0xbd   :  { %v56_v11 = vmul.f32 1.442695, %v55_v10  ;;  %v61_v14 = vsub.f32 %v55_v10, %v44_v7 }
  0xbf   :  { %100 = vpow2.f32 %v56_v11 }
  0xc5   :  { %v99_v12 = vpop.eup %98 }
  0xc6   :  { %v47_v13 = vsel %vm40_vm0, %v99_v12, 0.0 }
  0xc7   :  { %48 = vadd.xlane.f32.xlu1 %v47_v13 }
  0xc9   :  { %v101_v15 = vpop.eup %100 }
  0xca   :  { %v58_v16 = vsel %vm40_vm0, %v101_v15, 0.0  ;;  %v62_v17 = vmul.f32 %v101_v15, %v61_v14 }
  0xcb   :  { %59 = vadd.xlane.f32.xlu1 %v58_v16 }
  0xcc   :  { %v63_v18 = vsel %vm40_vm0, %v62_v17, 0.0 }
  0xcd   :  { %64 = vadd.xlane.f32.xlu0 %v63_v18 }
 0x154   :  { %v49_v19 = vpop.xlane.xlu1 %48 }
 0x155   :  { %102 = vlog2.f32 %v49_v19 }
 0x158   :  { %v60_v20 = vpop.xlane.xlu1 %59 }
 0x159   :  { %104 = vrcp.f32 %v60_v20 }
 0x15a   :  { %106 = vlog2.f32 %v60_v20  ;;  %v65_v26 = vpop.xlane.xlu0 %64 }
 0x15f   :  { %v103_v21 = vpop.eup %102 }
 0x160   :  { %v51_v24 = vmul.f32 0.6931472, %v103_v21 }
 0x163   :  { %v105_v22 = vpop.eup %104 }
 0x164   :  { %v107_v23 = vpop.eup %106  ;;  %v67_v27 = vmul.f32 %v105_v22, %v65_v26 }
 0x165   :  { %v69_v25 = vmul.f32 0.6931472, %v107_v23 }
 0x167   :  { %v70_v28 = vsub.f32 %v51_v24, %v69_v25 }
 0x169   :  { %v71_v29 = vadd.f32 %v70_v28, %v67_v27 }
 0x16b   :  { %v72_v30 = vrot.slane %v71_v29, 4 }
 0x16d   :  { %v73_v31 = vadd.f32 %v72_v30, %v71_v29 }
 0x16f   :  { %v74_v32 = vrot.slane %v73_v31, 2 }
 0x171   :  { %v75_v33 = vadd.f32 %v74_v32, %v73_v31 }
 0x173   :  { %v76_v34 = vrot.slane %v75_v33, 1 }
 0x175   :  { %v77_v35 = vadd.f32 %v76_v34, %v75_v33 }
 0x177   :  { %78 = vst [vmem:[#allocation7] sm:$0xff] %v77_v35 }
 0x178   :  { %163 = shalt.err (!%p160_p6)
}
 0x179   :  { %s164_s8 = scalar_lea.hbm %s241_s2, 128 }
 0x17a   :  { %p165_p7 = scmp.ne.s32.totalorder %s241_s2, %s164_s8  ;;  %p168_p8 = scmp.lt.u32.totalorder %s164_s8, %s241_s2 }
 0x17c   :  { %p170_p9 = pnand %p168_p8, %p165_p7 }
 0x17e   :  { %173 = shalt.err (!%p170_p9)
}
 0x17f   :  { %88 = dma.vmem_to_hbm [thread:$0]  %s86_s4, 128, %s241_s2, [#allocation4]  }
 0x180   :  { %178 = dma.done.wait [#allocation4], 128  }
 0x181   :  { %179 = vsyncadd [#allocation4], 4294967168 }
 0x182   :  { %92 = vsyncpa [#allocation3], 1 }
 0x183   :  { %93 = vsyncpa [#allocation6], 1 }
 0x184   :  { %94 = vsyncpa [#allocation4], 1 }

</bundles_post_ra>
